<compile_context>
chip_gen: v7x
topology: tpu7x:2x2x1
jax: 0.10.0
libtpu: 0.0.40
codegen_flags: <defaults>
</compile_context>

<pallas_src>
import functools
import numpy as np
import jax
import jax.numpy as jnp
from jax.experimental import pallas as pl
from jax.experimental.pallas import tpu as pltpu

PAD = 0

VMEM_SPEC = pl.BlockSpec(memory_space=pltpu.MemorySpace.VMEM)


# ----------------------------- tiling helpers -----------------------------

def _row_tile(m, cap=512):
    """Largest sublane-aligned divisor of m that is <= cap (m is a multiple of 8 here)."""
    if m <= cap:
        return m
    for t in range(cap - cap % 8, 7, -8):
        if m % t == 0:
            return t
    return m


def _col_tile(n, cap=1024):
    """Largest lane-aligned divisor of n that is <= cap."""
    if n <= cap:
        return n
    for t in range(cap - cap % 128, 127, -128):
        if n % t == 0:
            return t
    return n


# ----------------------------- shared kernel math -----------------------------

def _gru_gates(gx, gh, h):
    """Pointwise GRU gate math (gate order r|z|n), f32."""
    H = h.shape[-1]
    r = jax.nn.sigmoid(gx[:, :H] + gh[:, :H])
    z = jax.nn.sigmoid(gx[:, H:2 * H] + gh[:, H:2 * H])
    n = jnp.tanh(gx[:, 2 * H:] + r * gh[:, 2 * H:])
    return (1.0 - z) * n + z * h


def _gru_step(x, h, wi, wh, bi, bh):
    """PyTorch-semantics GRU cell. x:[B,Cin] f32, h:[B,H] f32, wi:[Cin,3H] bf16,
    wh:[H,3H] bf16, bi/bh:[1,3H] f32 -> [B,H] f32."""
    gx = jnp.dot(x.astype(jnp.bfloat16), wi, preferred_element_type=jnp.float32) + bi
    gh = jnp.dot(h.astype(jnp.bfloat16), wh, preferred_element_type=jnp.float32) + bh
    return _gru_gates(gx, gh, h)


def _attend(hidden, ctx_bf, cache_bf, neg_mask, wq, bq, v):
    """Bahdanau attention, one step.
    hidden:[B,H] f32, ctx_bf:[B,S,C] bf16, cache_bf:[B,S,H] bf16, neg_mask:[B,S] f32
    (additive, -1e9 at PAD), wq:[H,H] bf16, bq:[1,H] f32, v:[1,1,H] f32 -> [B,C] f32."""
    q = jnp.dot(hidden.astype(jnp.bfloat16), wq,
                preferred_element_type=jnp.float32) + bq                 # [B,H]
    # pointwise/transcendental math kept f32 (v5e has no bf16 VPU/EUP).
    e = jnp.tanh(q[:, None, :] + cache_bf.astype(jnp.float32))          # [B,S,H]
    scores = jnp.sum(e * v, axis=-1) + neg_mask                         # [B,S]
    m = jnp.max(scores, axis=-1, keepdims=True)
    p = jnp.exp(scores - m)
    p = p * pl.reciprocal(jnp.sum(p, axis=-1, keepdims=True), approx=True)
    # weighted context on the MXU (batched matmul) instead of VPU mult + XLU reduce.
    ctx_w = jnp.einsum('bqs,bsc->bqc',
                       p[:, None, :].astype(jnp.bfloat16), ctx_bf,
                       preferred_element_type=jnp.float32)              # [B,1,C]
    return ctx_w[:, 0]


# ----------------------------- generic tiled linear -----------------------------

def _linear_kernel(x_ref, w_ref, b_ref, o_ref, *, act):
    y = jnp.dot(x_ref[...].astype(jnp.bfloat16), w_ref[...],
                preferred_element_type=jnp.float32) + b_ref[...]
    if act == "tanh":
        y = jnp.tanh(y)
    o_ref[...] = y


def linear(x, w, b, act=None, row_cap=512):
    """x:[M,K] f32 @ w:[K,N] bf16 + b:[1,N] f32 -> [M,N] f32 (optional tanh).
    Row-tiled grid so it pipelines at production M."""
    M, K = x.shape
    N = w.shape[1]
    tm = _row_tile(M, row_cap)
    return pl.pallas_call(
        functools.partial(_linear_kernel, act=act),
        grid=(M // tm,),
        out_shape=jax.ShapeDtypeStruct((M, N), jnp.float32),
        in_specs=[pl.BlockSpec((tm, K), lambda i: (i, 0)),
                  pl.BlockSpec((K, N), lambda i: (0, 0)),
                  pl.BlockSpec((1, N), lambda i: (0, 0))],
        out_specs=pl.BlockSpec((tm, N), lambda i: (i, 0)),
        compiler_params=pltpu.CompilerParams(dimension_semantics=("parallel",)),
    )(x, w, b)


# ----------------------------- attention (single step) -----------------------------

def _attention_kernel(q_ref, ctx_ref, cache_ref, mask_ref, wq_ref, bq_ref, v_ref, out_ref):
    out_ref[...] = _attend(q_ref[...], ctx_ref[...], cache_ref[...], mask_ref[...],
                           wq_ref[...], bq_ref[...], v_ref[...])


def attention(params, query, ctx_bf, cache_bf, neg_mask):
    B, _, C = ctx_bf.shape
    return pl.pallas_call(
        _attention_kernel,
        out_shape=jax.ShapeDtypeStruct((B, C), jnp.float32),
        in_specs=[VMEM_SPEC] * 7,
        out_specs=VMEM_SPEC,
    )(query, ctx_bf, cache_bf, neg_mask,
      params["attn_wq"], params["attn_bq"], params["attn_v"])


# ----------------------------- vocab-tiled generator (online LSE) -----------------------------

def _generator_kernel(x_ref, w_ref, logits_ref, lse_ref, m_scr, l_scr):
    j = pl.program_id(1)

    @pl.when(j == 0)
    def _():
        m_scr[...] = jnp.full_like(m_scr, -jnp.inf)
        l_scr[...] = jnp.zeros_like(l_scr)

    logits = jnp.dot(x_ref[...].astype(jnp.bfloat16), w_ref[...],
                     preferred_element_type=jnp.float32)                 # [tm, tv]
    logits_ref[...] = logits

    m_prev = m_scr[...]
    m_new = jnp.maximum(m_prev, jnp.max(logits, axis=-1, keepdims=True))
    l_scr[...] = (l_scr[...] * jnp.exp(m_prev - m_new)
                  + jnp.sum(jnp.exp(logits - m_new), axis=-1, keepdims=True))
    m_scr[...] = m_new

    @pl.when(j == pl.num_programs(1) - 1)
    def _():
        lse_ref[...] = m_scr[...] + jnp.log(l_scr[...])


def generator(x_flat, gen_w, row_cap=256, vocab_cap=1024):
    """Log-softmax projection, tiled over (rows, vocab) with online log-sum-exp so the
    weight / logits never need one monolithic VMEM block (v7x 64 MiB friendly)."""
    M, Dw = x_flat.shape
    V = gen_w.shape[1]
    tm = _row_tile(M, row_cap)
    tv = _col_tile(V, vocab_cap)
    logits, lse = pl.pallas_call(
        _generator_kernel,
        grid=(M // tm, V // tv),
        out_shape=(jax.ShapeDtypeStruct((M, V), jnp.float32),
                   jax.ShapeDtypeStruct((M, 1), jnp.float32)),
        in_specs=[pl.BlockSpec((tm, Dw), lambda i, j: (i, 0)),
                  pl.BlockSpec((Dw, tv), lambda i, j: (0, j))],
        out_specs=(pl.BlockSpec((tm, tv), lambda i, j: (i, j)),
                   pl.BlockSpec((tm, 1), lambda i, j: (i, 0))),
        scratch_shapes=[pltpu.VMEM((tm, 1), jnp.float32),
                        pltpu.VMEM((tm, 1), jnp.float32)],
        compiler_params=pltpu.CompilerParams(
            dimension_semantics=("parallel", "arbitrary")),
    )(x_flat, gen_w)
    return logits - lse                                                 # final log-probs


# ----------------------------- encoder: hoisted input proj + recurrent kernel -----------------------------

def _encoder_kernel(gx_ref, wh_ref, bh_ref, out_ref, h_scr):
    t = pl.program_id(1)

    @pl.when(t == 0)
    def _():
        h_scr[...] = jnp.zeros_like(h_scr)

    h = h_scr[...]
    gh = jnp.dot(h.astype(jnp.bfloat16), wh_ref[0],
                 preferred_element_type=jnp.float32) + bh_ref[0]
    new_h = _gru_gates(gx_ref[0], gh, h)                                # gx precomputed
    h_scr[...] = new_h
    out_ref[...] = new_h[None]                                          # [1,B,H]


def encode(params, src, d_model):
    B, S = src.shape
    Dw = params["emb_src"].shape[1]
    H = d_model
    emb = jnp.take(params["emb_src"], src, axis=0)                      # [B,S,Dw]
    emb_flat = jnp.transpose(emb, (1, 0, 2)).reshape(S * B, Dw)         # time-major rows

    # Hoisted GRU input projection: both directions fused -> one [S*B,Dw] x [Dw,6H] matmul.
    gx = linear(emb_flat, params["enc_wi"], params["enc_bi"]).reshape(S, B, 6 * H)

    # direction d: 0 = forward (pos = t), 1 = backward (pos = S-1-t)
    pos = lambda d, t: t + d * (S - 1 - 2 * t)

    out = pl.pallas_call(
        _encoder_kernel,
        grid=(2, S),
        out_shape=jax.ShapeDtypeStruct((S, B, 2 * H), jnp.float32),     # concatenated layout
        in_specs=[
            pl.BlockSpec((1, B, 3 * H), lambda d, t: (pos(d, t), 0, d)),   # gx slice
            pl.BlockSpec((1, H, 3 * H), lambda d, t: (d, 0, 0)),           # W_h (resident)
            pl.BlockSpec((1, 1, 3 * H), lambda d, t: (d, 0, 0)),           # b_h
        ],
        out_specs=pl.BlockSpec((1, B, H), lambda d, t: (pos(d, t), 0, d)),
        scratch_shapes=[pltpu.VMEM((B, H), jnp.float32)],
        compiler_params=pltpu.CompilerParams(
            dimension_semantics=("parallel", "arbitrary")),
    )(gx, params["enc_wh"], params["enc_bh"])
    return jnp.transpose(out, (1, 0, 2))                                # [B,S,2H]


# ----------------------------- decoder: (direction, step) grid, no parity selects -----------------------------

def _decoder_kernel(dec_init_ref, ctx_ref, cache_ref, mask_ref,
                    wq_ref, bq_ref, v_ref,
                    wi_ref, wh_ref, bi_ref, bh_ref,
                    out_w_ref, out_b_ref, emb_w_ref, emb_b_ref, emb_ref,
                    out_ref, h_scr):
    j = pl.program_id(1)

    @pl.when(j == 0)
    def _():
        h_scr[...] = dec_init_ref[...]        # both chains start from dec_init

    hidden = h_scr[...]

    # Bahdanau attention over the (resident, bf16) encoder context.
    enc_context = _attend(hidden, ctx_ref[...], cache_ref[...], mask_ref[...],
                          wq_ref[...], bq_ref[...], v_ref[...])          # [B,C] f32

    # GRU step; direction weights selected by the BlockSpec index_map (no jnp.where).
    new_h = _gru_step(enc_context, hidden, wi_ref[0], wh_ref[0], bi_ref[0], bh_ref[0])
    h_scr[...] = new_h

    # linear_out(h) + linear_emb(previous embedding) fused into the step.
    out = (jnp.dot(new_h.astype(jnp.bfloat16), out_w_ref[...],
                   preferred_element_type=jnp.float32) + out_b_ref[...]
           + jnp.dot(emb_ref[0], emb_w_ref[...],
                     preferred_element_type=jnp.float32) + emb_b_ref[...])
    out_ref[...] = out[None]                                             # [1,B,Dw]


def decoder_forward(params, ctx_bf, cache_bf, neg_mask, embeddings, dec_init, middle_output):
    Bp, L, Dw = embeddings.shape
    S, C = ctx_bf.shape[1], ctx_bf.shape[2]
    H = dec_init.shape[-1]
    n_steps = L - 1
    n_half = -(-n_steps // 2)                  # ceil: steps per direction
    n_pad = 2 * n_half                         # padded output length (sliced below)

    # time-major embeddings, bf16 (only feed the bf16 MXU emb projection).
    emb_t = jnp.transpose(embeddings, (1, 0, 2)).astype(jnp.bfloat16)   # [L,B,Dw]

    dec_out = pl.pallas_call(
        _decoder_kernel,
        grid=(2, n_half),                      # d=0: rnn_right (t=1,3,..), d=1: rnn_left (t=2,4,..)
        out_shape=jax.ShapeDtypeStruct((n_pad, Bp, Dw), jnp.float32),
        in_specs=[
            pl.BlockSpec((Bp, H), lambda d, j: (0, 0)),                 # dec_init
            pl.BlockSpec((Bp, S, C), lambda d, j: (0, 0, 0)),           # ctx (bf16, resident)
            pl.BlockSpec((Bp, S, H), lambda d, j: (0, 0, 0)),           # attn key cache (bf16, resident)
            pl.BlockSpec((Bp, S), lambda d, j: (0, 0)),                 # additive mask
            pl.BlockSpec((H, H), lambda d, j: (0, 0)),                  # attn Wq
            pl.BlockSpec((1, H), lambda d, j: (0, 0)),                  # attn bq
            pl.BlockSpec((1, 1, H), lambda d, j: (0, 0, 0)),            # attn v
            pl.BlockSpec((1, C, 3 * H), lambda d, j: (d, 0, 0)),        # GRU W_i  (per direction)
            pl.BlockSpec((1, H, 3 * H), lambda d, j: (d, 0, 0)),        # GRU W_h
            pl.BlockSpec((1, 1, 3 * H), lambda d, j: (d, 0, 0)),        # GRU b_i
            pl.BlockSpec((1, 1, 3 * H), lambda d, j: (d, 0, 0)),        # GRU b_h
            pl.BlockSpec((H, Dw), lambda d, j: (0, 0)),                 # linear_out W
            pl.BlockSpec((1, Dw), lambda d, j: (0, 0)),                 # linear_out b
            pl.BlockSpec((Dw, Dw), lambda d, j: (0, 0)),                # linear_emb W
            pl.BlockSpec((1, Dw), lambda d, j: (0, 0)),                 # linear_emb b
            pl.BlockSpec((1, Bp, Dw), lambda d, j: (2 * j + d, 0, 0)),  # embeddings[t-1]
        ],
        out_specs=pl.BlockSpec((1, Bp, Dw), lambda d, j: (2 * j + d, 0, 0)),
        scratch_shapes=[pltpu.VMEM((Bp, H), jnp.float32)],              # per-chain hidden
        compiler_params=pltpu.CompilerParams(
            dimension_semantics=("parallel", "arbitrary"),
            vmem_limit_bytes=48 * 1024 * 1024),
    )(dec_init, ctx_bf, cache_bf, neg_mask,
      params["attn_wq"], params["attn_bq"], params["attn_v"],
      params["dec_wi"], params["dec_wh"], params["dec_bi"], params["dec_bh"],
      params["out_w"], params["out_b"], params["emb_w"], params["emb_b"],
      emb_t)

    dec_out = jnp.transpose(dec_out[:n_steps], (1, 0, 2))               # [Bp, L-1, Dw]
    outputs = jnp.concatenate([middle_output[:, None, :], dec_out], axis=1)   # [Bp, L, Dw]
    logp = generator(outputs.reshape(Bp * L, Dw), params["gen_w"])
    return logp.reshape(Bp, L, -1)


# ----------------------------- parameter init -----------------------------

def _init_gru_fused(key, in_dim, hid):
    k1, k2 = jax.random.split(key)
    return {
        "wi": (jax.random.normal(k1, (in_dim, 3 * hid), jnp.float32) * 0.1).astype(jnp.bfloat16),
        "wh": (jax.random.normal(k2, (hid, 3 * hid), jnp.float32) * 0.1).astype(jnp.bfloat16),
        "bi": jnp.zeros((1, 3 * hid), jnp.float32),
        "bh": jnp.zeros((1, 3 * hid), jnp.float32),
    }


def init_params(key, n_src_vocab, n_tgt_vocab, d_word_vec, d_model):
    ctx_size = 2 * d_model
    ks = jax.random.split(key, 16)
    bf16 = lambda k, shp: (jax.random.normal(k, shp, jnp.float32) * 0.1).astype(jnp.bfloat16)
    f32 = lambda k, shp: jax.random.normal(k, shp, jnp.float32) * 0.1
    zeros = lambda shp: jnp.zeros(shp, jnp.float32)

    p = {}
    p["emb_src"] = f32(ks[0], (n_src_vocab, d_word_vec))
    p["emb_tgt"] = f32(ks[1], (n_tgt_vocab, d_word_vec))

    gf = _init_gru_fused(ks[2], d_word_vec, d_model)   # encoder fwd
    gb = _init_gru_fused(ks[3], d_word_vec, d_model)   # encoder bwd
    p["enc_wi"] = jnp.concatenate([gf["wi"], gb["wi"]], axis=1)   # [Dw, 6H] bf16 (fused dirs)
    p["enc_bi"] = jnp.concatenate([gf["bi"], gb["bi"]], axis=1)   # [1, 6H]  f32
    p["enc_wh"] = jnp.stack([gf["wh"], gb["wh"]])                 # [2, H, 3H] bf16
    p["enc_bh"] = jnp.stack([gf["bh"], gb["bh"]])                 # [2, 1, 3H] f32

    p["bridge_w"] = bf16(ks[4], (ctx_size, d_model)); p["bridge_b"] = zeros((1, d_model))
    p["attn_wq"] = bf16(ks[5], (d_model, d_model));   p["attn_bq"] = zeros((1, d_model))
    p["attn_wk"] = bf16(ks[6], (ctx_size, d_model));  p["attn_bk0"] = zeros((1, d_model))
    p["attn_v"] = f32(ks[7], (1, 1, d_model))
    p["cls_w"] = bf16(ks[8], (ctx_size, d_word_vec)); p["cls_b"] = zeros((1, d_word_vec))

    gr = _init_gru_fused(ks[9], ctx_size, d_model)     # rnn_right
    gl = _init_gru_fused(ks[10], ctx_size, d_model)    # rnn_left
    p["dec_wi"] = jnp.stack([gr["wi"], gl["wi"]])      # [2, C, 3H] bf16 (d=0 right, d=1 left)
    p["dec_wh"] = jnp.stack([gr["wh"], gl["wh"]])      # [2, H, 3H] bf16
    p["dec_bi"] = jnp.stack([gr["bi"], gl["bi"]])      # [2, 1, 3H] f32
    p["dec_bh"] = jnp.stack([gr["bh"], gl["bh"]])      # [2, 1, 3H] f32

    p["out_w"] = bf16(ks[11], (d_model, d_word_vec)); p["out_b"] = zeros((1, d_word_vec))
    p["emb_w"] = bf16(ks[12], (d_word_vec, d_word_vec)); p["emb_b"] = zeros((1, d_word_vec))
    p["gen_w"] = bf16(ks[13], (d_word_vec, n_tgt_vocab))   # generator (bias-free projection)
    return p


# ----------------------------- model forward -----------------------------

def build_sorted_trg(trg_np, y_len_np, middle_words_np):
    # data-dependent python/pad_sequence logic from init_decoder_when_train (host-side glue)
    B, _ = trg_np.shape
    middle_index = [1] * B
    lefts = [trg_np[i, :middle_index[i]][::-1] for i in range(B)]
    rights = [trg_np[i, middle_index[i] + 1: int(y_len_np[i]) + 2] for i in range(B)]
    left_len = max(len(l) for l in lefts)
    right_len = max(len(r) for r in rights)
    left_trg = np.full((B, left_len), PAD, dtype=trg_np.dtype)
    right_trg = np.full((B, right_len), PAD, dtype=trg_np.dtype)
    for i in range(B):
        left_trg[i, :len(lefts[i])] = lefts[i]
        right_trg[i, :len(rights[i])] = rights[i]
    max_index = max(left_len, right_len)
    cols = [np.asarray(middle_words_np)]
    pad_col = np.full((B,), PAD, dtype=trg_np.dtype)
    for i in range(max_index):
        cols.append(right_trg[:, i] if i < right_len else pad_col)
        cols.append(left_trg[:, i] if i < left_len else pad_col)
    return np.stack(cols, axis=-1)          # [B, 1 + 2*max_index]


def middle_forward(params, src, trg, y_len, d_model):
    B = src.shape[0]
    Bp = int(-(-B // 8) * 8)                 # pad batch to f32-sublane multiple (>= 8)
    src_p = jnp.pad(src, ((0, Bp - B), (0, 0)), constant_values=PAD)

    ctx = encode(params, src_p, d_model)                                # [Bp,S,2H] f32
    S, C = ctx.shape[1], ctx.shape[2]

    pad_mask = (src_p == PAD)
    neg_mask = jnp.where(pad_mask, -1e9, 0.0).astype(jnp.float32)       # additive attn mask
    no_pad = (~pad_mask).astype(jnp.float32)

    # init_decoder: masked mean -> tanh(linear_bridge), attention key cache
    denom = jnp.maximum(jnp.sum(no_pad, axis=1, keepdims=True), 1.0)    # guard all-PAD pad rows
    ctx_mean = jnp.sum(ctx * no_pad[:, :, None], axis=1) / denom
    dec_init = linear(ctx_mean, params["bridge_w"], params["bridge_b"], act="tanh")
    cache = linear(ctx.reshape(Bp * S, C),
                   params["attn_wk"], params["attn_bk0"]).reshape(Bp, S, -1)

    # decoder-resident copies in bf16 (they only feed bf16 MXU ops)
    ctx_bf = ctx.astype(jnp.bfloat16)
    cache_bf = cache.astype(jnp.bfloat16)

    # get_middle_word (training path)
    middle_ctx = attention(params, dec_init, ctx_bf, cache_bf, neg_mask)
    middle_output = linear(middle_ctx, params["cls_w"], params["cls_b"], act="tanh")
    middle_words = trg[:, 1]

    # sorted_trg + embeddings (host-side, data-dependent); pad rows are all-PAD
    sorted_trg = build_sorted_trg(np.asarray(trg), np.asarray(y_len),
                                  np.asarray(middle_words))
    sorted_pad = np.full((Bp, sorted_trg.shape[1]), PAD, dtype=sorted_trg.dtype)
    sorted_pad[:B] = sorted_trg
    embeddings = jnp.take(params["emb_tgt"], jnp.asarray(sorted_pad), axis=0)  # [Bp,L,Dw]

    # alternating L2R / R2L decoding (fused kernel, parallel direction axis)
    logp = decoder_forward(params, ctx_bf, cache_bf, neg_mask, embeddings,
                           dec_init, middle_output)
    return logp[:B], jnp.asarray(sorted_trg)


# ----------------------------------- main -----------------------------------

if __name__ == "__main__":
    n_src_vocab, n_tgt_vocab = 32, 256
    d_word_vec, d_model = 128, 128          # lane-dense (multiples of 128)
    B, S_src, T_trg = 2, 8, 8

    key = jax.random.PRNGKey(0)
    pk, sk, tk = jax.random.split(key, 3)
    params = init_params(pk, n_src_vocab, n_tgt_vocab, d_word_vec, d_model)

    src = jax.random.randint(sk, (B, S_src), 4, n_src_vocab).astype(jnp.int32)
    src = src.at[0, -2:].set(PAD)                      # some padding in example 0
    trg = jax.random.randint(tk, (B, T_trg), 4, n_tgt_vocab).astype(jnp.int32)
    y_len = np.array([4, 5], dtype=np.int32)

    outputs, sorted_trg = middle_forward(params, src, trg, y_len, d_model)
    jax.block_until_ready(outputs)

    assert outputs.shape[0] == B
    assert outputs.shape[1] == sorted_trg.shape[1]
    assert outputs.shape[2] == n_tgt_vocab
    assert bool(jnp.all(jnp.isfinite(outputs)))
    print("KERNEL_OK")
</pallas_src>

<mosaic_0001>
module attributes {stable_mosaic.version = 11 : i64} {
  func.func @_linear_kernel(%arg0: i32, %arg1: memref<64x128xf32, #tpu.memory_space<vmem>>, %arg2: memref<128x768xbf16, #tpu.memory_space<vmem>>, %arg3: memref<1x768xf32, #tpu.memory_space<vmem>>, %arg4: memref<64x768xf32, #tpu.memory_space<vmem>>) attributes {dimension_semantics = [#tpu.dimension_semantics<parallel>], iteration_bounds = array<i64: 1>, scalar_prefetch = 0 : i64, scratch_operands = 0 : i64, tpu.core_type = #tpu.core_type<tc>, window_params = [{transform_indices = @transform_0, window_bounds = array<i64: 64, 128>}, {pipeline_mode = #tpu.pipeline_mode<synchronous>, transform_indices = @transform_1, window_bounds = array<i64: 128, 768>}, {pipeline_mode = #tpu.pipeline_mode<synchronous>, transform_indices = @transform_2, window_bounds = array<i64: 1, 768>}, {transform_indices = @transform_3, window_bounds = array<i64: 64, 768>}]} {
    %c0 = arith.constant 0 : index
    %c0_0 = arith.constant 0 : index
    %0 = vector.load %arg1[%c0, %c0_0] : memref<64x128xf32, #tpu.memory_space<vmem>>, vector<64x128xf32>
    %1 = arith.truncf %0 : vector<64x128xf32> to vector<64x128xbf16>
    %c0_1 = arith.constant 0 : index
    %c0_2 = arith.constant 0 : index
    %2 = vector.load %arg2[%c0_1, %c0_2] : memref<128x768xbf16, #tpu.memory_space<vmem>>, vector<128x768xbf16>
    %cst = arith.constant dense<0.000000e+00> : vector<64x768xf32>
    %3 = tpu.matmul %1, %2, %cst {dimension_numbers = #tpu.dot_dimension_numbers<[1], [0], [0], [1], [0, 0, 1, 1], [], []>} : vector<64x128xbf16>, vector<128x768xbf16>, vector<64x768xf32> -> vector<64x768xf32>
    %c0_3 = arith.constant 0 : index
    %c0_4 = arith.constant 0 : index
    %4 = vector.load %arg3[%c0_3, %c0_4] : memref<1x768xf32, #tpu.memory_space<vmem>>, vector<1x768xf32>
    %5 = vector.broadcast %4 : vector<1x768xf32> to vector<64x768xf32>
    %6 = arith.addf %3, %5 : vector<64x768xf32>
    %c0_5 = arith.constant 0 : index
    %c0_6 = arith.constant 0 : index
    %7 = vector.load %arg4[%c0_5, %c0_6] : memref<64x768xf32, #tpu.memory_space<vmem>>, vector<64x768xf32>
    tpu.vector_store %arg4[%c0_5, %c0_6], %6 {strides = array<i32>} : memref<64x768xf32, #tpu.memory_space<vmem>>, vector<64x768xf32>,
    return
  }
  func.func @transform_0(%arg0: i32) -> (i32, i32) {
    %c0_i32 = arith.constant 0 : i32
    %c0_i32_0 = arith.constant 0 : i32
    return %arg0, %c0_i32 : i32, i32
  }
  func.func @transform_1(%arg0: i32) -> (i32, i32) {
    %c0_i32 = arith.constant 0 : i32
    %c0_i32_0 = arith.constant 0 : i32
    %c0_i32_1 = arith.constant 0 : i32
    return %c0_i32, %c0_i32_0 : i32, i32
  }
  func.func @transform_2(%arg0: i32) -> (i32, i32) {
    %c0_i32 = arith.constant 0 : i32
    %c0_i32_0 = arith.constant 0 : i32
    %c0_i32_1 = arith.constant 0 : i32
    return %c0_i32, %c0_i32_0 : i32, i32
  }
  func.func @transform_3(%arg0: i32) -> (i32, i32) {
    %c0_i32 = arith.constant 0 : i32
    %c0_i32_0 = arith.constant 0 : i32
    return %arg0, %c0_i32 : i32, i32
  }
}

</mosaic_0001>

<bundles_post_ra>
// kernel: tpu_custom_call.1
= control target key start
LH: loop header
LB: loop body
LE: loop exit
PB: predicated region body
PF: predicated region fallthrough
CT: control target
= control target key end

     0   :  { %8 = vsyncpa [#allocation3], 0  ;;  %s1021_s0 = inlined_call_operand.hbm [shape: f32[64,128], index: 0, kind: input, shape index: {}]   ;;  %s1022_s1 = inlined_call_operand.hbm [shape: bf16[128,768], index: 1, kind: input, shape index: {}]   ;;  %s1023_s2 = inlined_call_operand.vmem [shape: f32[1,768], index: 2, kind: input, shape index: {}]   ;;  %s1024_s3 = inlined_call_operand.hbm [shape: f32[64,768], index: 3, kind: output, shape index: {}]  }
   0x1   :  { %9 = vsyncpa [#allocation6], 0 }
   0x2   :  { %10 = vsyncpa [#allocation4], 0  ;;  %s879_s12 = smov [#allocation2]   ;;  %s807_s16 = scalar_lea.hbm %s1021_s0, 1024 }
   0x3   :  { %s16_s13 = sshll.u32 %s879_s12, 4  ;;  %p808_p0 = scmp.ne.s32.totalorder %s1021_s0, %s807_s16  ;;  %s17_s13 = int_to_ptr.vmem [resolvable:$true] %s16_s13 }
   0x4   :  { %p811_p1 = scmp.lt.u32.totalorder %s807_s16, %s1021_s0 }
   0x6   :  { %p813_p2 = pnand %p811_p1, %p808_p0 }
   0x8   :  { %816 = shalt.err (!%p813_p2)
}
   0x9   :  { %s817_s21 = scalar_lea.vmem %s17_s13, 1024  ;;  %p822_p4 = scmp.lt.s32.totalorder %s17_s13, %s17_s13 }
   0xa   :  { %p818_p3 = scmp.ne.s32.totalorder %s17_s13, %s817_s21  ;;  %p823_p5 = scmp.lt.s32.totalorder %s817_s21, %s817_s21 }
   0xc   :  { %p824_p6 = por %p823_p5, %p822_p4 }
   0xe   :  { %p825_p7 = pnand %p824_p6, %p818_p3 }
  0x10   :  { %828 = shalt.err (!%p825_p7)
}
  0x11   :  { %s880_s22 = smov 128   ;;  %s881_s23 = smov 8  }
  0x12   :  { %22 = dma.hbm_to_vmem [thread:$0]  %s1021_s0, 1024, %s17_s13, [#allocation3], %s880_s22, %s880_s22, %s881_s23  }
  0x13   :  { %s882_s26 = smov [#allocation5]   ;;  %s829_s30 = scalar_lea.hbm %s1022_s1, 6144 }
  0x14   :  { %s28_s27 = sshll.u32 %s882_s26, 4  ;;  %p830_p8 = scmp.ne.s32.totalorder %s1022_s1, %s829_s30  ;;  %s29_s27 = int_to_ptr.vmem [resolvable:$true] %s28_s27 }
  0x15   :  { %p833_p9 = scmp.lt.u32.totalorder %s829_s30, %s1022_s1 }
  0x17   :  { %p835_p10 = pnand %p833_p9, %p830_p8 }
  0x19   :  { %838 = shalt.err (!%p835_p10)
}
  0x1a   :  { %s839_s8 = scalar_lea.vmem %s29_s27, 6144  ;;  %p844_p12 = scmp.lt.s32.totalorder %s29_s27, %s29_s27 }
  0x1b   :  { %p840_p11 = scmp.ne.s32.totalorder %s29_s27, %s839_s8  ;;  %p845_p13 = scmp.lt.s32.totalorder %s839_s8, %s839_s8 }
  0x1d   :  { %p846_p0 = por %p845_p13, %p844_p12 }
  0x1f   :  { %p847_p1 = pnand %p846_p0, %p840_p11 }
  0x21   :  { %850 = shalt.err (!%p847_p1)
}
  0x22   :  { %s883_s0 = smov 384   ;;  %s884_s9 = smov 24  }
  0x23   :  { %34 = dma.hbm_to_vmem [thread:$0]  %s1022_s1, 6144, %s29_s27, [#allocation6], %s883_s0, %s883_s0, %s884_s9  }
  0x24   :  { %873 = dma.done.wait [#allocation3], 1024  }
  0x25   :  { %874 = vsyncadd [#allocation3], 4294966272 }
  0x26   :  { %875 = dma.done.wait [#allocation6], 6144  }
  0x27   :  { %876 = vsyncadd [#allocation6], 4294961152  ;;  %v885_v0 = vmov 0   ;;  %v735_v1 = vld [vmem:[#allocation5 + $0x4] ss:$24 sps:$4 sm:$0xff]   ;;  %v45_v34 = vld [vmem:[#allocation2 + $0x8] sm:$0xff]  ;;  %v106_v61 = vlaneseq }
  0x28   :  { %408 = vmatprep.mubr.bf16.mxu0 %v885_v0  ;;  %481 = vmatprep.mubr.bf16.mxu1 %v885_v0  ;;  %v737_v2 = vld [vmem:[#allocation5 + $0xc] ss:$24 sps:$4 sm:$0xff]   ;;  %v739_v3 = vld [vmem:[#allocation5] ss:$24 sps:$4 sm:$0xff]   ;;  %v743_v6 = vld [vmem:[#allocation5 + $0x3c] ss:$24 sps:$4 sm:$0xff]  }
  0x29   :  { %376 = vmatprep.subr.bf16.mxu0 %v735_v1  ;;  %v740_v4 = vld [vmem:[#allocation5 + $0x8] ss:$24 sps:$4 sm:$0xff]   ;;  %449 = vmatprep.subr.bf16.mxu1 %v737_v2  ;;  %v741_v5 = vld [vmem:[#allocation5 + $0x34] ss:$24 sps:$4 sm:$0xff]   ;;  %v746_v8 = vld [vmem:[#allocation5 + $0x38] ss:$24 sps:$4 sm:$0xff]  }
  0x2a   :  { %377 = vmatpush1.bf16.msra.mxu0 %v739_v3  ;;  %450 = vmatpush1.bf16.msra.mxu1 %v740_v4  ;;  %v745_v7 = vld [vmem:[#allocation5 + $0x30] ss:$24 sps:$4 sm:$0xff]   ;;  %v747_v9 = vld [vmem:[#allocation5 + $0x64] ss:$24 sps:$4 sm:$0xff]   ;;  %v751_v11 = vld [vmem:[#allocation5 + $0x60] ss:$24 sps:$4 sm:$0xff]  }
  0x2b   :  { %378 = vmatprep.subr.bf16.mxu0 %v741_v5  ;;  %451 = vmatprep.subr.bf16.mxu1 %v743_v6  ;;  %v749_v10 = vld [vmem:[#allocation5 + $0x6c] ss:$24 sps:$4 sm:$0xff]   ;;  %v752_v12 = vld [vmem:[#allocation5 + $0x68] ss:$24 sps:$4 sm:$0xff]   ;;  %v755_v14 = vld [vmem:[#allocation5 + $0x9c] ss:$24 sps:$4 sm:$0xff]  }
  0x2c   :  { %v753_v13 = vld [vmem:[#allocation5 + $0x94] ss:$24 sps:$4 sm:$0xff]   ;;  %v757_v15 = vld [vmem:[#allocation5 + $0x90] ss:$24 sps:$4 sm:$0xff]   ;;  %v759_v17 = vld [vmem:[#allocation5 + $0xc4] ss:$24 sps:$4 sm:$0xff]  }
  0x2d   :  { %v758_v16 = vld [vmem:[#allocation5 + $0x98] ss:$24 sps:$4 sm:$0xff]   ;;  %v761_v18 = vld [vmem:[#allocation5 + $0xcc] ss:$24 sps:$4 sm:$0xff]   ;;  %v764_v20 = vld [vmem:[#allocation5 + $0xc8] ss:$24 sps:$4 sm:$0xff]  }
  0x2e   :  { %379 = vmatpush1.bf16.msra.mxu0 %v745_v7  ;;  %452 = vmatpush1.bf16.msra.mxu1 %v746_v8  ;;  %v763_v19 = vld [vmem:[#allocation5 + $0xc0] ss:$24 sps:$4 sm:$0xff]   ;;  %v765_v21 = vld [vmem:[#allocation5 + $0xf4] ss:$24 sps:$4 sm:$0xff]   ;;  %v769_v23 = vld [vmem:[#allocation5 + $0xf0] ss:$24 sps:$4 sm:$0xff]  }
  0x2f   :  { %380 = vmatprep.subr.bf16.mxu0 %v747_v9  ;;  %453 = vmatprep.subr.bf16.mxu1 %v749_v10  ;;  %v767_v22 = vld [vmem:[#allocation5 + $0xfc] ss:$24 sps:$4 sm:$0xff]   ;;  %v770_v24 = vld [vmem:[#allocation5 + $0xf8] ss:$24 sps:$4 sm:$0xff]   ;;  %v773_v26 = vld [vmem:[#allocation5 + $0x12c] ss:$24 sps:$4 sm:$0xff]  }
  0x30   :  { %v771_v25 = vld [vmem:[#allocation5 + $0x124] ss:$24 sps:$4 sm:$0xff]   ;;  %v775_v27 = vld [vmem:[#allocation5 + $0x120] ss:$24 sps:$4 sm:$0xff]   ;;  %v777_v29 = vld [vmem:[#allocation5 + $0x154] ss:$24 sps:$4 sm:$0xff]  }
  0x31   :  { %v776_v28 = vld [vmem:[#allocation5 + $0x128] ss:$24 sps:$4 sm:$0xff]   ;;  %v779_v30 = vld [vmem:[#allocation5 + $0x15c] ss:$24 sps:$4 sm:$0xff]   ;;  %v782_v32 = vld [vmem:[#allocation5 + $0x158] ss:$24 sps:$4 sm:$0xff]  }
  0x32   :  { %381 = vmatpush1.bf16.msra.mxu0 %v751_v11  ;;  %454 = vmatpush1.bf16.msra.mxu1 %v752_v12  ;;  %v781_v31 = vld [vmem:[#allocation5 + $0x150] ss:$24 sps:$4 sm:$0xff]   ;;  %v44_v33 = vld [vmem:[#allocation2] sm:$0xff]  ;;  %v785_v35 = vld [vmem:[#allocation5 + $0x14] ss:$24 sps:$4 sm:$0xff]   ;;  %v950_v62 = vshrl.u32 %v106_v61, 7 }
  0x33   :  { %382 = vmatprep.subr.bf16.mxu0 %v753_v13  ;;  %455 = vmatprep.subr.bf16.mxu1 %v755_v14  ;;  %v935_v36 = vpack.c.bf16 %v45_v34, %v44_v33  ;;  %v783_v37 = vld [vmem:[#allocation5 + $0x10] ss:$24 sps:$4 sm:$0xff]   ;;  %v788_v38 = vld [vmem:[#allocation5 + $0x44] ss:$24 sps:$4 sm:$0xff]   ;;  %v786_v39 = vld [vmem:[#allocation5 + $0x40] ss:$24 sps:$4 sm:$0xff]  }
  0x34   :  { %v46_v40 = vld [vmem:[#allocation2 + $0x10] sm:$0xff]  ;;  %v47_v41 = vld [vmem:[#allocation2 + $0x18] sm:$0xff]  ;;  %v48_v47 = vld [vmem:[#allocation2 + $0x20] sm:$0xff]  ;;  %v108_v63 = vsub.s32 0, %v950_v62  ;;  %v116_v1 = vsub.s32 2, %v950_v62  ;;  %v112_v3 = vsub.s32 1, %v950_v62 }
  0x35   :  { %v791_v42 = vld [vmem:[#allocation5 + $0x74] ss:$24 sps:$4 sm:$0xff]   ;;  %v53_v43 = vpack.c.bf16 %v47_v41, %v46_v40  ;;  %v789_v44 = vld [vmem:[#allocation5 + $0x70] ss:$24 sps:$4 sm:$0xff]   ;;  %v794_v45 = vld [vmem:[#allocation5 + $0xa4] ss:$24 sps:$4 sm:$0xff]  }
  0x36   :  { %383 = vmatpush1.bf16.msra.mxu0 %v757_v15  ;;  %456 = vmatpush1.bf16.msra.mxu1 %v758_v16  ;;  %v792_v46 = vld [vmem:[#allocation5 + $0xa0] ss:$24 sps:$4 sm:$0xff]   ;;  %v49_v48 = vld [vmem:[#allocation2 + $0x28] sm:$0xff]  ;;  %v800_v52 = vld [vmem:[#allocation5 + $0x104] ss:$24 sps:$4 sm:$0xff]   ;;  %v120_v4 = vsub.s32 3, %v950_v62 }
  0x37   :  { %384 = vmatprep.subr.bf16.mxu0 %v759_v17  ;;  %457 = vmatprep.subr.bf16.mxu1 %v761_v18  ;;  %v797_v49 = vld [vmem:[#allocation5 + $0xd4] ss:$24 sps:$4 sm:$0xff]   ;;  %v54_v50 = vpack.c.bf16 %v49_v48, %v48_v47  ;;  %v795_v51 = vld [vmem:[#allocation5 + $0xd0] ss:$24 sps:$4 sm:$0xff]   ;;  %v798_v53 = vld [vmem:[#allocation5 + $0x100] ss:$24 sps:$4 sm:$0xff]  }
  0x38   :  { %v50_v54 = vld [vmem:[#allocation2 + $0x30] sm:$0xff]  ;;  %v51_v55 = vld [vmem:[#allocation2 + $0x38] sm:$0xff]  ;;  %v957_v2 = vld [vmem:[%s1023_s2] sm:$0x3f]  ;;  %s886_s2 = smov [#allocation7]  }
  0x39   :  { %v803_v56 = vld [vmem:[#allocation5 + $0x134] ss:$24 sps:$4 sm:$0xff]   ;;  %v55_v57 = vpack.c.bf16 %v51_v55, %v50_v54  ;;  %v801_v58 = vld [vmem:[#allocation5 + $0x130] ss:$24 sps:$4 sm:$0xff]   ;;  %v806_v59 = vld [vmem:[#allocation5 + $0x164] ss:$24 sps:$4 sm:$0xff]   ;;  %v965_v5 = vrot.slane %v957_v2, %v116_v1  ;;  %v968_v6 = vrot.slane %v957_v2, %v112_v3  ;;  %v971_v7 = vrot.slane %v957_v2, %v120_v4 }
  0x3a   :  { %385 = vmatpush1.bf16.msra.mxu0 %v763_v19  ;;  %458 = vmatpush1.bf16.msra.mxu1 %v764_v20  ;;  %v804_v60 = vld [vmem:[#allocation5 + $0x160] ss:$24 sps:$4 sm:$0xff]   ;;  %s648_s13 = sshll.u32 %s886_s2, 4  ;;  %s649_s13 = int_to_ptr.vmem [resolvable:$true] %s648_s13 }
  0x3b   :  { %386 = vmatprep.subr.bf16.mxu0 %v765_v21  ;;  %459 = vmatprep.subr.bf16.mxu1 %v767_v22  ;;  %s851_s14 = scalar_lea.vmem %s649_s13, 6144  ;;  %p856_p3 = scmp.lt.s32.totalorder %s649_s13, %s649_s13 }
  0x3c   :  { %p852_p2 = scmp.ne.s32.totalorder %s649_s13, %s851_s14  ;;  %p857_p4 = scmp.lt.s32.totalorder %s851_s14, %s851_s14 }
  0x3e   :  { %387 = vmatpush1.bf16.msra.mxu0 %v769_v23  ;;  %460 = vmatpush1.bf16.msra.mxu1 %v770_v24  ;;  %p858_p5 = por %p857_p4, %p856_p3 }
  0x3f   :  { %388 = vmatprep.subr.bf16.mxu0 %v771_v25  ;;  %461 = vmatprep.subr.bf16.mxu1 %v773_v26 }
  0x40   :  { %p859_p6 = pnand %p858_p5, %p852_p2 }
  0x42   :  { %389 = vmatpush1.bf16.msra.mxu0 %v775_v27  ;;  %462 = vmatpush1.bf16.msra.mxu1 %v776_v28 }
  0x43   :  { %390 = vmatprep.subr.bf16.mxu0 %v777_v29  ;;  %463 = vmatprep.subr.bf16.mxu1 %v779_v30 }
  0x46   :  { %391 = vmatpush1.bf16.msra.mxu0 %v781_v31  ;;  %464 = vmatpush1.bf16.msra.mxu1 %v782_v32 }
  0x47   :  { %522 = vmatprep.subr.bf16.mxu0 %v785_v35  ;;  %709 = vmatprep.subr.bf16.mxu1 %v785_v35 }
  0x49   :  { %409 = vmatmul.mubr.bf16.vlgmr.msra.gmra.mrb[0].mxu0 %v935_v36  ;;  %482 = vmatmul.mubr.bf16.vlgmr.msra.gmra.mrb[0].mxu1 %v935_v36 }
  0x4a   :  { %523 = vmatpush1.bf16.msra.mxu0 %v783_v37  ;;  %717 = vmatpush1.bf16.msra.mxu1 %v783_v37 }
  0x4b   :  { %524 = vmatprep.subr.bf16.mxu0 %v788_v38  ;;  %710 = vmatprep.subr.bf16.mxu1 %v788_v38 }
  0x4c   :  { %418 = vmatprep.mubr.bf16.mxu0 %v885_v0  ;;  %491 = vmatprep.mubr.bf16.mxu1 %v885_v0 }
  0x4e   :  { %525 = vmatpush1.bf16.msra.mxu0 %v786_v39  ;;  %718 = vmatpush1.bf16.msra.mxu1 %v786_v39 }
  0x4f   :  { %526 = vmatprep.subr.bf16.mxu0 %v791_v42  ;;  %711 = vmatprep.subr.bf16.mxu1 %v791_v42 }
  0x51   :  { %419 = vmatmul.mubr.bf16.gmra.mrb[4].mxu0 %v53_v43  ;;  %492 = vmatmul.mubr.bf16.gmra.mrb[4].mxu1 %v53_v43 }
  0x52   :  { %527 = vmatpush1.bf16.msra.mxu0 %v789_v44  ;;  %719 = vmatpush1.bf16.msra.mxu1 %v789_v44 }
  0x53   :  { %528 = vmatprep.subr.bf16.mxu0 %v794_v45  ;;  %712 = vmatprep.subr.bf16.mxu1 %v794_v45 }
  0x54   :  { %428 = vmatprep.mubr.bf16.mxu0 %v885_v0  ;;  %501 = vmatprep.mubr.bf16.mxu1 %v885_v0 }
  0x56   :  { %529 = vmatpush1.bf16.msra.mxu0 %v792_v46  ;;  %720 = vmatpush1.bf16.msra.mxu1 %v792_v46 }
  0x57   :  { %530 = vmatprep.subr.bf16.mxu0 %v797_v49  ;;  %713 = vmatprep.subr.bf16.mxu1 %v797_v49 }
  0x59   :  { %429 = vmatmul.mubr.bf16.gmra.mrb[8].mxu0 %v54_v50  ;;  %502 = vmatmul.mubr.bf16.gmra.mrb[8].mxu1 %v54_v50 }
  0x5a   :  { %531 = vmatpush1.bf16.msra.mxu0 %v795_v51  ;;  %721 = vmatpush1.bf16.msra.mxu1 %v795_v51 }
  0x5b   :  { %532 = vmatprep.subr.bf16.mxu0 %v800_v52  ;;  %714 = vmatprep.subr.bf16.mxu1 %v800_v52 }
  0x5c   :  { %438 = vmatprep.mubr.bf16.mxu0 %v885_v0  ;;  %511 = vmatprep.mubr.bf16.mxu1 %v885_v0 }
  0x5e   :  { %533 = vmatpush1.bf16.msra.mxu0 %v798_v53  ;;  %722 = vmatpush1.bf16.msra.mxu1 %v798_v53 }
  0x5f   :  { %534 = vmatprep.subr.bf16.mxu0 %v803_v56  ;;  %715 = vmatprep.subr.bf16.mxu1 %v803_v56 }
  0x61   :  { %439 = vmatmul.mubr.bf16.gmra.mrb[12].mxu0 %v55_v57  ;;  %512 = vmatmul.mubr.bf16.gmra.mrb[12].mxu1 %v55_v57 }
  0x62   :  { %535 = vmatpush1.bf16.msra.mxu0 %v801_v58  ;;  %723 = vmatpush1.bf16.msra.mxu1 %v801_v58 }
  0x63   :  { %536 = vmatprep.subr.bf16.mxu0 %v806_v59  ;;  %716 = vmatprep.subr.bf16.mxu1 %v806_v59 }
  0x64   :  { %554 = vmatprep.mubr.bf16.mxu0 %v885_v0  ;;  %574 = vmatprep.mubr.bf16.mxu1 %v885_v0 }
  0x66   :  { %537 = vmatpush1.bf16.msra.mxu0 %v804_v60  ;;  %724 = vmatpush1.bf16.msra.mxu1 %v804_v60 }
  0x69   :  { %555 = vmatmul.mubr.bf16.vlgmr.msra.gmra.mrb[16].mxu0 %v935_v36  ;;  %575 = vmatmul.mubr.bf16.vlgmr.msra.gmra.mrb[16].mxu1 %v54_v50 }
  0x6a   :  { %564 = vmatprep.mubr.bf16.mxu0 %v885_v0  ;;  %584 = vmatprep.mubr.bf16.mxu1 %v885_v0  ;;  %v962_v0 = vrot.slane %v957_v2, %v108_v63  ;;  %v124_v63 = vsub.s32 4, %v950_v62 }
  0x71   :  { %565 = vmatmul.mubr.bf16.gmra.mrb[20].mxu0 %v53_v43  ;;  %585 = vmatmul.mubr.bf16.gmra.mrb[20].mxu1 %v55_v57 }
 0x11c   :  { %v410_v8 = vpop.f32.mrb[0].mxu0  ;;  %v483_v9 = vpop.f32.mrb[0].mxu1 }
 0x11d   :  { %v411_v10 = vadd.f32 %v410_v8, %v962_v0  ;;  %v484_v11 = vadd.f32 %v483_v9, %v965_v5  ;;  %v412_v12 = vpop.f32.mrb[1].mxu0  ;;  %v485_v13 = vpop.f32.mrb[1].mxu1  ;;  %v128_v9 = vsub.s32 5, %v950_v62 }
 0x11e   :  { %v413_v14 = vadd.f32 %v412_v12, %v968_v6  ;;  %v486_v15 = vadd.f32 %v485_v13, %v971_v7  ;;  %v414_v16 = vpop.f32.mrb[2].mxu0  ;;  %v487_v17 = vpop.f32.mrb[2].mxu1 }
 0x11f   :  { %595 = vst [vmem:[#allocation7] sm:$0xff] %v411_v10  ;;  %597 = vst [vmem:[#allocation7 + $0x10] sm:$0xff] %v484_v11  ;;  %v415_v18 = vadd.f32 %v414_v16, %v962_v0  ;;  %v488_v19 = vadd.f32 %v487_v17, %v965_v5  ;;  %v416_v20 = vpop.f32.mrb[3].mxu0  ;;  %v489_v21 = vpop.f32.mrb[3].mxu1  ;;  %v125_v16 = vrot.slane %v957_v2, %v124_v63 }
 0x120   :  { %596 = vst [vmem:[#allocation7 + $0x8] sm:$0xff] %v413_v14  ;;  %598 = vst [vmem:[#allocation7 + $0x18] sm:$0xff] %v486_v15  ;;  %v417_v22 = vadd.f32 %v416_v20, %v968_v6  ;;  %v490_v23 = vadd.f32 %v489_v21, %v971_v7  ;;  %v129_v62 = vrot.slane %v957_v2, %v128_v9 }
 0x121   :  { %601 = vst [vmem:[#allocation7 + $0x30] sm:$0xff] %v415_v18  ;;  %603 = vst [vmem:[#allocation7 + $0x40] sm:$0xff] %v488_v19 }
 0x122   :  { %602 = vst [vmem:[#allocation7 + $0x38] sm:$0xff] %v417_v22  ;;  %604 = vst [vmem:[#allocation7 + $0x48] sm:$0xff] %v490_v23 }
 0x124   :  { %v420_v24 = vpop.f32.mrb[4].mxu0  ;;  %v493_v25 = vpop.f32.mrb[4].mxu1 }
 0x125   :  { %v421_v26 = vadd.f32 %v420_v24, %v962_v0  ;;  %v494_v27 = vadd.f32 %v493_v25, %v965_v5  ;;  %v422_v28 = vpop.f32.mrb[5].mxu0  ;;  %v495_v29 = vpop.f32.mrb[5].mxu1 }
 0x126   :  { %v423_v30 = vadd.f32 %v422_v28, %v968_v6  ;;  %v496_v31 = vadd.f32 %v495_v29, %v971_v7  ;;  %v424_v32 = vpop.f32.mrb[6].mxu0  ;;  %v497_v33 = vpop.f32.mrb[6].mxu1 }
 0x127   :  { %607 = vst [vmem:[#allocation7 + $0x60] sm:$0xff] %v421_v26  ;;  %609 = vst [vmem:[#allocation7 + $0x70] sm:$0xff] %v494_v27  ;;  %v425_v34 = vadd.f32 %v424_v32, %v962_v0  ;;  %v498_v35 = vadd.f32 %v497_v33, %v965_v5  ;;  %v426_v36 = vpop.f32.mrb[7].mxu0  ;;  %v499_v37 = vpop.f32.mrb[7].mxu1 }
 0x128   :  { %608 = vst [vmem:[#allocation7 + $0x68] sm:$0xff] %v423_v30  ;;  %610 = vst [vmem:[#allocation7 + $0x78] sm:$0xff] %v496_v31  ;;  %v427_v38 = vadd.f32 %v426_v36, %v968_v6  ;;  %v500_v39 = vadd.f32 %v499_v37, %v971_v7 }
 0x129   :  { %613 = vst [vmem:[#allocation7 + $0x90] sm:$0xff] %v425_v34  ;;  %615 = vst [vmem:[#allocation7 + $0xa0] sm:$0xff] %v498_v35 }
 0x12a   :  { %614 = vst [vmem:[#allocation7 + $0x98] sm:$0xff] %v427_v38  ;;  %616 = vst [vmem:[#allocation7 + $0xa8] sm:$0xff] %v500_v39 }
 0x12c   :  { %v430_v40 = vpop.f32.mrb[8].mxu0  ;;  %v503_v41 = vpop.f32.mrb[8].mxu1 }
 0x12d   :  { %v431_v42 = vadd.f32 %v430_v40, %v962_v0  ;;  %v504_v43 = vadd.f32 %v503_v41, %v965_v5  ;;  %v432_v44 = vpop.f32.mrb[9].mxu0  ;;  %v505_v45 = vpop.f32.mrb[9].mxu1 }
 0x12e   :  { %v433_v46 = vadd.f32 %v432_v44, %v968_v6  ;;  %v506_v47 = vadd.f32 %v505_v45, %v971_v7  ;;  %v434_v48 = vpop.f32.mrb[10].mxu0  ;;  %v507_v49 = vpop.f32.mrb[10].mxu1 }
 0x12f   :  { %619 = vst [vmem:[#allocation7 + $0xc0] sm:$0xff] %v431_v42  ;;  %621 = vst [vmem:[#allocation7 + $0xd0] sm:$0xff] %v504_v43  ;;  %v435_v50 = vadd.f32 %v434_v48, %v962_v0  ;;  %v508_v51 = vadd.f32 %v507_v49, %v965_v5  ;;  %v436_v52 = vpop.f32.mrb[11].mxu0  ;;  %v509_v53 = vpop.f32.mrb[11].mxu1 }
 0x130   :  { %620 = vst [vmem:[#allocation7 + $0xc8] sm:$0xff] %v433_v46  ;;  %622 = vst [vmem:[#allocation7 + $0xd8] sm:$0xff] %v506_v47  ;;  %v437_v54 = vadd.f32 %v436_v52, %v968_v6  ;;  %v510_v55 = vadd.f32 %v509_v53, %v971_v7 }
 0x131   :  { %625 = vst [vmem:[#allocation7 + $0xf0] sm:$0xff] %v435_v50  ;;  %627 = vst [vmem:[#allocation7 + $0x100] sm:$0xff] %v508_v51 }
 0x132   :  { %626 = vst [vmem:[#allocation7 + $0xf8] sm:$0xff] %v437_v54  ;;  %628 = vst [vmem:[#allocation7 + $0x108] sm:$0xff] %v510_v55 }
 0x134   :  { %v440_v56 = vpop.f32.mrb[12].mxu0  ;;  %v513_v57 = vpop.f32.mrb[12].mxu1 }
 0x135   :  { %v441_v58 = vadd.f32 %v440_v56, %v962_v0  ;;  %v514_v59 = vadd.f32 %v513_v57, %v965_v5  ;;  %v442_v60 = vpop.f32.mrb[13].mxu0  ;;  %v515_v61 = vpop.f32.mrb[13].mxu1 }
 0x136   :  { %v443_v1 = vadd.f32 %v442_v60, %v968_v6  ;;  %v516_v3 = vadd.f32 %v515_v61, %v971_v7  ;;  %v444_v4 = vpop.f32.mrb[14].mxu0  ;;  %v517_v8 = vpop.f32.mrb[14].mxu1 }
 0x137   :  { %631 = vst [vmem:[#allocation7 + $0x120] sm:$0xff] %v441_v58  ;;  %633 = vst [vmem:[#allocation7 + $0x130] sm:$0xff] %v514_v59  ;;  %v445_v10 = vadd.f32 %v444_v4, %v962_v0  ;;  %v518_v11 = vadd.f32 %v517_v8, %v965_v5  ;;  %v446_v12 = vpop.f32.mrb[15].mxu0  ;;  %v519_v13 = vpop.f32.mrb[15].mxu1 }
 0x138   :  { %632 = vst [vmem:[#allocation7 + $0x128] sm:$0xff] %v443_v1  ;;  %634 = vst [vmem:[#allocation7 + $0x138] sm:$0xff] %v516_v3  ;;  %v447_v14 = vadd.f32 %v446_v12, %v968_v6  ;;  %v520_v15 = vadd.f32 %v519_v13, %v971_v7 }
 0x139   :  { %637 = vst [vmem:[#allocation7 + $0x150] sm:$0xff] %v445_v10  ;;  %639 = vst [vmem:[#allocation7 + $0x160] sm:$0xff] %v518_v11 }
 0x13a   :  { %638 = vst [vmem:[#allocation7 + $0x158] sm:$0xff] %v447_v14  ;;  %640 = vst [vmem:[#allocation7 + $0x168] sm:$0xff] %v520_v15 }
 0x13c   :  { %v556_v17 = vpop.f32.mrb[16].mxu0  ;;  %v576_v0 = vpop.f32.mrb[16].mxu1 }
 0x13d   :  { %v557_v18 = vadd.f32 %v556_v17, %v125_v16  ;;  %v577_v5 = vadd.f32 %v576_v0, %v125_v16  ;;  %v558_v19 = vpop.f32.mrb[17].mxu0  ;;  %v578_v20 = vpop.f32.mrb[17].mxu1 }
 0x13e   :  { %v559_v21 = vadd.f32 %v558_v19, %v129_v62  ;;  %v579_v22 = vadd.f32 %v578_v20, %v129_v62  ;;  %v560_v23 = vpop.f32.mrb[18].mxu0  ;;  %v580_v6 = vpop.f32.mrb[18].mxu1 }
 0x13f   :  { %599 = vst [vmem:[#allocation7 + $0x20] sm:$0xff] %v557_v18  ;;  %623 = vst [vmem:[#allocation7 + $0xe0] sm:$0xff] %v577_v5  ;;  %v561_v7 = vadd.f32 %v560_v23, %v125_v16  ;;  %v581_v24 = vadd.f32 %v580_v6, %v125_v16  ;;  %v562_v25 = vpop.f32.mrb[19].mxu0  ;;  %v582_v26 = vpop.f32.mrb[19].mxu1 }
 0x140   :  { %600 = vst [vmem:[#allocation7 + $0x28] sm:$0xff] %v559_v21  ;;  %624 = vst [vmem:[#allocation7 + $0xe8] sm:$0xff] %v579_v22  ;;  %v563_v27 = vadd.f32 %v562_v25, %v129_v62  ;;  %v583_v2 = vadd.f32 %v582_v26, %v129_v62 }
 0x141   :  { %605 = vst [vmem:[#allocation7 + $0x50] sm:$0xff] %v561_v7  ;;  %629 = vst [vmem:[#allocation7 + $0x110] sm:$0xff] %v581_v24 }
 0x142   :  { %606 = vst [vmem:[#allocation7 + $0x58] sm:$0xff] %v563_v27  ;;  %630 = vst [vmem:[#allocation7 + $0x118] sm:$0xff] %v583_v2 }
 0x144   :  { %v566_v28 = vpop.f32.mrb[20].mxu0  ;;  %v586_v29 = vpop.f32.mrb[20].mxu1 }
 0x145   :  { %v567_v30 = vadd.f32 %v566_v28, %v125_v16  ;;  %v587_v31 = vadd.f32 %v586_v29, %v125_v16  ;;  %v568_v32 = vpop.f32.mrb[21].mxu0  ;;  %v588_v33 = vpop.f32.mrb[21].mxu1 }
 0x146   :  { %v569_v34 = vadd.f32 %v568_v32, %v129_v62  ;;  %v589_v35 = vadd.f32 %v588_v33, %v129_v62  ;;  %v570_v36 = vpop.f32.mrb[22].mxu0  ;;  %v590_v37 = vpop.f32.mrb[22].mxu1 }
 0x147   :  { %611 = vst [vmem:[#allocation7 + $0x80] sm:$0xff] %v567_v30  ;;  %635 = vst [vmem:[#allocation7 + $0x140] sm:$0xff] %v587_v31  ;;  %v571_v38 = vadd.f32 %v570_v36, %v125_v16  ;;  %v591_v39 = vadd.f32 %v590_v37, %v125_v16  ;;  %v572_v40 = vpop.f32.mrb[23].mxu0  ;;  %v592_v41 = vpop.f32.mrb[23].mxu1 }
 0x148   :  { %612 = vst [vmem:[#allocation7 + $0x88] sm:$0xff] %v569_v34  ;;  %636 = vst [vmem:[#allocation7 + $0x148] sm:$0xff] %v589_v35  ;;  %v573_v42 = vadd.f32 %v572_v40, %v129_v62  ;;  %v593_v43 = vadd.f32 %v592_v41, %v129_v62 }
 0x149   :  { %617 = vst [vmem:[#allocation7 + $0xb0] sm:$0xff] %v571_v38  ;;  %641 = vst [vmem:[#allocation7 + $0x170] sm:$0xff] %v591_v39 }
 0x14a   :  { %618 = vst [vmem:[#allocation7 + $0xb8] sm:$0xff] %v573_v42  ;;  %642 = vst [vmem:[#allocation7 + $0x178] sm:$0xff] %v593_v43 }
 0x14b   :  { %862 = shalt.err (!%p859_p6)
}
 0x14c   :  { %s863_s17 = scalar_lea.hbm %s1024_s3, 6144 }
 0x14d   :  { %p864_p7 = scmp.ne.s32.totalorder %s1024_s3, %s863_s17  ;;  %p867_p8 = scmp.lt.u32.totalorder %s863_s17, %s1024_s3 }
 0x14f   :  { %p869_p9 = pnand %p867_p8, %p864_p7 }
 0x151   :  { %872 = shalt.err (!%p869_p9)
}
 0x152   :  { %s887_s22 = smov 768   ;;  %s888_s23 = smov 48  }
 0x153   :  { %654 = dma.vmem_to_hbm [thread:$0]  %s649_s13, 6144, %s1024_s3, [#allocation4], %s887_s22, %s887_s22, %s888_s23  }
 0x154   :  { %877 = dma.done.wait [#allocation4], 6144  }
 0x155   :  { %878 = vsyncadd [#allocation4], 4294961152 }
 0x156   :  { %658 = vsyncpa [#allocation3], 1 }
 0x157   :  { %659 = vsyncpa [#allocation6], 1 }
 0x158   :  { %660 = vsyncpa [#allocation4], 1 }

</bundles_post_ra>
